<compile_context>
chip_gen: v7x
topology: tpu7x:2x2x1
jax: 0.10.0
libtpu: 0.0.40
codegen_flags: <defaults>
</compile_context>

<pallas_src>
import jax
import jax.numpy as jnp
from jax import lax
from jax.experimental import pallas as pl
from jax.experimental.pallas import tpu as pltpu


# ----------------------------------------------------------------------------
# VMEM budget / tile-height selection (generation aware, padded-dim accounting)
# ----------------------------------------------------------------------------
def _round_up(x, m):
    return (x + m - 1) // m * m


def _vmem_capacity_bytes():
    try:
        return int(pltpu.get_tpu_info().vmem_capacity_bytes)
    except Exception:
        return 64 * 1024 * 1024  # conservative default (v7x per-core VMEM)


def _tile_footprint_bytes(TH, Din, Dout, esz):
    r8 = lambda v: _round_up(max(v, 1), 8)
    r128 = lambda v: _round_up(max(v, 1), 128)
    in_blk = r8(TH) * r128(Din) * esz
    halo = 2 * 8 * r128(Din) * esz                    # two 1-row blocks, padded to 8 sublanes
    out_blk = r8(TH) * r128(Dout) * esz
    wgt = r8(3 * Din) * r128(Dout) * esz
    vecs = 2 * 8 * r128(Dout) * esz                   # bias + alpha
    # in-kernel temporaries: rows (TH+2, Din), 3 shifted LHS views, f32 acc/y
    temps = (r8(TH + 2) + 3 * r8(TH)) * r128(Din) * esz + 3 * r8(TH) * r128(Dout) * 4
    # double-buffered DMA blocks + temporaries
    return 2 * (in_blk + halo + out_blk + wgt + vecs) + temps


def _choose_tile_h(H, Din, Dout, esz, budget_bytes):
    # TH must divide H and satisfy the (8,128) rule on the second-minor dim.
    cands = sorted({th for th in range(8, H + 1, 8) if H % th == 0} | {H})
    best = cands[0]
    for th in cands:
        if _tile_footprint_bytes(th, Din, Dout, esz) <= budget_bytes:
            best = max(best, th)
    return best


# ----------------------------------------------------------------------------
# Banded per-row weights: fold horizontal taps + SAME pad + PixelShuffle + bias
# ----------------------------------------------------------------------------
def _prep_block_params(w_hwio, b, alpha, W, r, compute_dtype):
    _, _, Cin, Cout = w_hwio.shape
    C = Cout // (r * r)
    Din = W * Cin
    Dout = r * W * r * C

    # Output column q encodes (i, w, j, c) with c fastest: q = ((i*W+w)*r+j)*C+c.
    q = jnp.arange(Dout)
    i_idx = q // (W * r * C)
    w_idx = (q // (r * C)) % W
    j_idx = (q // C) % r
    c_idx = q % C
    k_idx = c_idx * (r * r) + i_idx * r + j_idx        # PyTorch conv channel k

    # Input row position p encodes (w_in, ci) with ci fastest.
    p = jnp.arange(Din)
    w_in = p // Cin
    ci = p % Cin

    dx = w_in[:, None] - w_idx[None, :] + 1            # (Din, Dout)
    valid = (dx >= 0) & (dx <= 2)                      # out-of-band -> zero == SAME pad in W
    dx_c = jnp.clip(dx, 0, 2)

    mats = []
    for dy in range(3):
        vals = w_hwio[dy][dx_c, ci[:, None], k_idx[None, :]]   # (Din, Dout)
        mats.append(jnp.where(valid, vals, jnp.zeros((), w_hwio.dtype)))
    w_band = jnp.concatenate(mats, axis=0)             # (3*Din, Dout), rows = (dy, w_in, ci)

    b_flat = b[k_idx].reshape(1, Dout)
    a_flat = alpha[c_idx].reshape(1, Dout)
    return (w_band.astype(compute_dtype), b_flat.astype(compute_dtype),
            a_flat.astype(compute_dtype), Din, Dout, C)


# ----------------------------------------------------------------------------
# Kernel: fused conv3x3 (vertical halo in-kernel) + bias + PReLU + shuffle
# ----------------------------------------------------------------------------
def _make_kernel(TH, Din, Dout):
    def kernel(xm_ref, xt_ref, xb_ref, w_ref, b_ref, a_ref, o_ref):
        # xm_ref: (1, TH, Din)      current row tile (Din = W*Cin, lane-dense)
        # xt_ref: (1, 1, 1, Din)    row above the tile (index clamped at border)
        # xb_ref: (1, 1, 1, Din)    row below the tile (index clamped at border)
        # w_ref : (3*Din, Dout)     banded weights, stacked along rows by dy
        # b_ref : (1, Dout)         bias, already in shuffled column order
        # a_ref : (1, Dout)         PReLU slope, already in shuffled column order
        # o_ref : (1, TH, Dout)     shuffled output rows (Dout = r*W*r*C, lane-dense)
        t = pl.program_id(1)
        T = pl.num_programs(1)

        xm = xm_ref[0]                                  # (TH, Din)
        top = xt_ref[0, 0]                              # (1, Din)
        bot = xb_ref[0, 0]                              # (1, Din)
        # zero-mask halo rows at the image border (vertical SAME padding)
        top = jnp.where(t > 0, top, jnp.zeros_like(top))
        bot = jnp.where(t < T - 1, bot, jnp.zeros_like(bot))
        rows = jnp.concatenate([top, xm, bot], axis=0)  # (TH + 2, Din)

        # conv + shuffle as 3 lane-dense matmuls, f32 accumulation
        acc = jnp.zeros((TH, Dout), jnp.float32)
        for dy in range(3):
            acc = acc + jnp.dot(rows[dy:dy + TH, :],
                                w_ref[dy * Din:(dy + 1) * Din, :],
                                preferred_element_type=jnp.float32)

        # bias + PReLU in f32 (v5e has no bf16 VALU/EUP); PReLU commutes with shuffle
        y = acc + b_ref[...].astype(jnp.float32)
        a = a_ref[...].astype(jnp.float32)
        y = jnp.where(y >= 0.0, y, a * y)
        o_ref[0] = y.astype(o_ref.dtype)                # single contiguous lane-dense store

    return kernel


# ----------------------------------------------------------------------------
# One _SubPixelBlock on the flat (N, H, W*Cin) layout
# ----------------------------------------------------------------------------
def subpixel_block_flat(x_flat, params, r, tile_h=None, compute_dtype=jnp.float32):
    w_hwio, b, alpha = params
    N, H, Din_in = x_flat.shape
    Cin = w_hwio.shape[2]
    W = Din_in // Cin
    assert W * Cin == Din_in, (W, Cin, Din_in)

    w_band, b_flat, a_flat, Din, Dout, C = _prep_block_params(
        w_hwio, b, alpha, W, r, compute_dtype)

    esz = jnp.dtype(compute_dtype).itemsize
    cap = _vmem_capacity_bytes()
    budget = int(cap * 0.40)
    vmem_limit = int(cap * 0.60)

    if tile_h is None:
        TH = _choose_tile_h(H, Din, Dout, esz, budget)
    else:
        TH = tile_h
        assert H % TH == 0 and (TH % 8 == 0 or TH == H), (H, TH)
    T = H // TH

    x_c = x_flat.astype(compute_dtype)
    # halo view: last two dims (1, Din) equal the full array dims -> legal 1-row blocks
    x_rows = x_c.reshape(N, H, 1, Din)

    kernel = _make_kernel(TH, Din, Dout)

    out = pl.pallas_call(
        kernel,
        out_shape=jax.ShapeDtypeStruct((N, H, Dout), compute_dtype),
        grid=(N, T),
        in_specs=[
            # main row tile, lane-dense
            pl.BlockSpec((1, TH, Din), lambda n, t: (n, t, 0)),
            # 1-row halos; index maps clamp at the border, kernel zero-masks there
            pl.BlockSpec((1, 1, 1, Din),
                         lambda n, t: (n, jnp.maximum(t * TH - 1, 0), 0, 0)),
            pl.BlockSpec((1, 1, 1, Din),
                         lambda n, t: (n, jnp.minimum((t + 1) * TH, H - 1), 0, 0)),
            # banded weights / bias / alpha: constant index -> resident across the grid
            pl.BlockSpec((3 * Din, Dout), lambda n, t: (0, 0)),
            pl.BlockSpec((1, Dout), lambda n, t: (0, 0)),
            pl.BlockSpec((1, Dout), lambda n, t: (0, 0)),
        ],
        out_specs=pl.BlockSpec((1, TH, Dout), lambda n, t: (n, t, 0)),
        compiler_params=pltpu.CompilerParams(
            dimension_semantics=("parallel", "parallel"),
            vmem_limit_bytes=vmem_limit,
        ),
    )(x_c, x_rows, x_rows, w_band, b_flat, a_flat)

    # (N, H, r*W*r*C) is byte-identical to shuffled flat NHWC -> free reshape
    return out.reshape(N, H * r, (W * r) * C)


def scale_module_apply(x_nchw, params_list, scales, tile_h=None,
                       compute_dtype=jnp.float32):
    N, Cin, H, W = x_nchw.shape
    # NCHW -> flat NHWC (N, H, W*Cin), once at the module boundary
    x = jnp.transpose(x_nchw, (0, 2, 3, 1)).reshape(N, H, W * Cin)
    for p, r in zip(params_list, scales):
        x = subpixel_block_flat(x, p, r, tile_h=tile_h, compute_dtype=compute_dtype)
    C = params_list[-1][2].shape[0]
    Hf = x.shape[1]
    Wf = x.shape[2] // C
    out = jnp.transpose(x.reshape(N, Hf, Wf, C), (0, 3, 1, 2))
    return out.astype(x_nchw.dtype)


# ----------------------------------------------------------------------------
# Deterministic parameter init (matches module shapes, PyTorch-style bounds)
# ----------------------------------------------------------------------------
def init_params(key, in_channels, out_channels, scales):
    params = []
    c = in_channels
    for scale in scales:
        n_out = out_channels * scale * scale
        key, kw, kb = jax.random.split(key, 3)
        bound = 1.0 / float(jnp.sqrt(c * 9.0))
        w = jax.random.uniform(kw, (3, 3, c, n_out), jnp.float32, -bound, bound)  # HWIO
        b = jax.random.uniform(kb, (n_out,), jnp.float32, -bound, bound)
        alpha = jnp.full((out_channels,), 0.25, jnp.float32)                      # PReLU default
        params.append((w, b, alpha))
        c = out_channels
    return params


# ----------------------------------------------------------------------------
# Pure-JAX reference (lax.conv, PyTorch op order) for correctness check
# ----------------------------------------------------------------------------
def _ref_block(x_nhwc, params, r):
    w, b, alpha = params
    y = lax.conv_general_dilated(
        x_nhwc, w, window_strides=(1, 1), padding="SAME",
        dimension_numbers=("NHWC", "HWIO", "NHWC"),
        precision=lax.Precision.HIGHEST)
    y = y + b[None, None, None, :]
    N, H, W, Cr2 = y.shape
    C = Cr2 // (r * r)
    # PixelShuffle with PyTorch channel order k = c*r^2 + i*r + j
    y = y.reshape(N, H, W, C, r, r).transpose(0, 1, 4, 2, 5, 3).reshape(N, H * r, W * r, C)
    a = alpha[None, None, None, :]
    return jnp.where(y >= 0, y, a * y)                 # PReLU after shuffle, as in PyTorch


def _ref_apply(x_nchw, params_list, scales):
    x = jnp.transpose(x_nchw, (0, 2, 3, 1))
    for p, r in zip(params_list, scales):
        x = _ref_block(x, p, r)
    return jnp.transpose(x, (0, 3, 1, 2))


if __name__ == "__main__":
    key = jax.random.PRNGKey(0)
    kx, kp = jax.random.split(key)

    # small config: in_channels=4, out_channels=4, scales=[2, 2]
    in_channels, out_channels, scales = 4, 4, [2, 2]
    N, H, W = 2, 16, 16

    x = jax.random.normal(kx, (N, in_channels, H, W), jnp.float32)   # NCHW
    params = init_params(kp, in_channels, out_channels, scales)

    ref = jax.block_until_ready(_ref_apply(x, params, scales))

    # f32 path, auto tile size
    out = jax.block_until_ready(scale_module_apply(x, params, scales))
    assert out.shape == (N, out_channels, H * 4, W * 4), out.shape
    # tolerance absorbs MXU f32-pass-count differences vs the HIGHEST-precision ref
    assert jnp.allclose(out, ref, rtol=5e-3, atol=5e-3), float(
        jnp.max(jnp.abs(out - ref)))

    # forced H-tiling (exercises the halo / multi-tile / parallel-grid path)
    out_t = jax.block_until_ready(scale_module_apply(x, params, scales, tile_h=8))
    assert jnp.allclose(out_t, ref, rtol=5e-3, atol=5e-3), float(
        jnp.max(jnp.abs(out_t - ref)))

    # bf16 I/O path (halved HBM traffic; f32 accumulate + f32 elementwise in-kernel)
    out_bf = jax.block_until_ready(
        scale_module_apply(x, params, scales, compute_dtype=jnp.bfloat16))
    assert jnp.allclose(out_bf, ref, rtol=1e-1, atol=1e-1), float(
        jnp.max(jnp.abs(out_bf - ref)))

    print("KERNEL_OK")
</pallas_src>

<mosaic_0001>
module attributes {stable_mosaic.version = 11 : i64} {
  func.func @kernel(%arg0: i32, %arg1: i32, %arg2: memref<1x16x64xf32, #tpu.memory_space<vmem>>, %arg3: memref<1x1x1x64xf32, #tpu.memory_space<vmem>>, %arg4: memref<1x1x1x64xf32, #tpu.memory_space<vmem>>, %arg5: memref<192x256xf32, #tpu.memory_space<vmem>>, %arg6: memref<1x256xf32, #tpu.memory_space<vmem>>, %arg7: memref<1x256xf32, #tpu.memory_space<vmem>>, %arg8: memref<1x16x256xf32, #tpu.memory_space<vmem>>) attributes {dimension_semantics = [#tpu.dimension_semantics<parallel>, #tpu.dimension_semantics<parallel>], iteration_bounds = array<i64: 2, 1>, scalar_prefetch = 0 : i64, scratch_operands = 0 : i64, tpu.core_type = #tpu.core_type<tc>, window_params = [{transform_indices = @transform_0, window_bounds = array<i64: 1, 16, 64>}, {transform_indices = @transform_1, window_bounds = array<i64: 1, 1, 1, 64>}, {transform_indices = @transform_2, window_bounds = array<i64: 1, 1, 1, 64>}, {pipeline_mode = #tpu.pipeline_mode<synchronous>, transform_indices = @transform_3, window_bounds = array<i64: 192, 256>}, {pipeline_mode = #tpu.pipeline_mode<synchronous>, transform_indices = @transform_4, window_bounds = array<i64: 1, 256>}, {pipeline_mode = #tpu.pipeline_mode<synchronous>, transform_indices = @transform_5, window_bounds = array<i64: 1, 256>}, {transform_indices = @transform_6, window_bounds = array<i64: 1, 16, 256>}]} {
    %c0 = arith.constant 0 : index
    %c0_0 = arith.constant 0 : index
    %c0_1 = arith.constant 0 : index
    %0 = vector.load %arg2[%c0, %c0_0, %c0_1] : memref<1x16x64xf32, #tpu.memory_space<vmem>>, vector<1x16x64xf32>
    %1 = vector.shape_cast %0 : vector<1x16x64xf32> to vector<16x64xf32>
    %c0_2 = arith.constant 0 : index
    %c0_3 = arith.constant 0 : index
    %c0_4 = arith.constant 0 : index
    %c0_5 = arith.constant 0 : index
    %2 = vector.load %arg3[%c0_2, %c0_3, %c0_4, %c0_5] : memref<1x1x1x64xf32, #tpu.memory_space<vmem>>, vector<1x1x1x64xf32>
    %3 = vector.shape_cast %2 : vector<1x1x1x64xf32> to vector<1x64xf32>
    %c0_6 = arith.constant 0 : index
    %c0_7 = arith.constant 0 : index
    %c0_8 = arith.constant 0 : index
    %c0_9 = arith.constant 0 : index
    %4 = vector.load %arg4[%c0_6, %c0_7, %c0_8, %c0_9] : memref<1x1x1x64xf32, #tpu.memory_space<vmem>>, vector<1x1x1x64xf32>
    %5 = vector.shape_cast %4 : vector<1x1x1x64xf32> to vector<1x64xf32>
    %c0_i32 = arith.constant 0 : i32
    %6 = arith.cmpi sgt, %arg1, %c0_i32 : i32
    %cst = arith.constant 0.000000e+00 : f32
    %7 = vector.broadcast %cst : f32 to vector<1x64xf32>
    %8 = arith.select %6, %3, %7 : vector<1x64xf32>
    %c0_i32_10 = arith.constant 0 : i32
    %9 = arith.cmpi slt, %arg1, %c0_i32_10 : i32
    %cst_11 = arith.constant 0.000000e+00 : f32
    %10 = vector.broadcast %cst_11 : f32 to vector<1x64xf32>
    %11 = arith.select %9, %5, %10 : vector<1x64xf32>
    %12 = tpu.concatenate %8, %1, %11 in 0 : vector<1x64xf32>, vector<16x64xf32>, vector<1x64xf32> -> vector<18x64xf32>
    %cst_12 = arith.constant 0.000000e+00 : f32
    %13 = vector.broadcast %cst_12 : f32 to vector<16x256xf32>
    %14 = vector.extract_strided_slice %12 {offsets = [0, 0], sizes = [16, 64], strides = [1, 1]} : vector<18x64xf32> to vector<16x64xf32>
    %c0_13 = arith.constant 0 : index
    %c0_14 = arith.constant 0 : index
    %15 = vector.load %arg5[%c0_13, %c0_14] : memref<192x256xf32, #tpu.memory_space<vmem>>, vector<64x256xf32>
    %cst_15 = arith.constant dense<0.000000e+00> : vector<16x256xf32>
    %16 = tpu.matmul %14, %15, %cst_15 {dimension_numbers = #tpu.dot_dimension_numbers<[1], [0], [0], [1], [0, 0, 1, 1], [], []>} : vector<16x64xf32>, vector<64x256xf32>, vector<16x256xf32> -> vector<16x256xf32>
    %17 = arith.addf %13, %16 : vector<16x256xf32>
    %18 = vector.extract_strided_slice %12 {offsets = [1, 0], sizes = [16, 64], strides = [1, 1]} : vector<18x64xf32> to vector<16x64xf32>
    %c64 = arith.constant 64 : index
    %c0_16 = arith.constant 0 : index
    %19 = vector.load %arg5[%c64, %c0_16] : memref<192x256xf32, #tpu.memory_space<vmem>>, vector<64x256xf32>
    %cst_17 = arith.constant dense<0.000000e+00> : vector<16x256xf32>
    %20 = tpu.matmul %18, %19, %cst_17 {dimension_numbers = #tpu.dot_dimension_numbers<[1], [0], [0], [1], [0, 0, 1, 1], [], []>} : vector<16x64xf32>, vector<64x256xf32>, vector<16x256xf32> -> vector<16x256xf32>
    %21 = arith.addf %17, %20 : vector<16x256xf32>
    %22 = vector.extract_strided_slice %12 {offsets = [2, 0], sizes = [16, 64], strides = [1, 1]} : vector<18x64xf32> to vector<16x64xf32>
    %c128 = arith.constant 128 : index
    %c0_18 = arith.constant 0 : index
    %23 = vector.load %arg5[%c128, %c0_18] : memref<192x256xf32, #tpu.memory_space<vmem>>, vector<64x256xf32>
    %cst_19 = arith.constant dense<0.000000e+00> : vector<16x256xf32>
    %24 = tpu.matmul %22, %23, %cst_19 {dimension_numbers = #tpu.dot_dimension_numbers<[1], [0], [0], [1], [0, 0, 1, 1], [], []>} : vector<16x64xf32>, vector<64x256xf32>, vector<16x256xf32> -> vector<16x256xf32>
    %25 = arith.addf %21, %24 : vector<16x256xf32>
    %c0_20 = arith.constant 0 : index
    %c0_21 = arith.constant 0 : index
    %26 = vector.load %arg6[%c0_20, %c0_21] : memref<1x256xf32, #tpu.memory_space<vmem>>, vector<1x256xf32>
    %27 = vector.broadcast %26 : vector<1x256xf32> to vector<16x256xf32>
    %28 = arith.addf %25, %27 : vector<16x256xf32>
    %c0_22 = arith.constant 0 : index
    %c0_23 = arith.constant 0 : index
    %29 = vector.load %arg7[%c0_22, %c0_23] : memref<1x256xf32, #tpu.memory_space<vmem>>, vector<1x256xf32>
    %cst_24 = arith.constant 0.000000e+00 : f32
    %30 = vector.broadcast %cst_24 : f32 to vector<16x256xf32>
    %31 = arith.cmpf oge, %28, %30 : vector<16x256xf32>
    %32 = vector.broadcast %29 : vector<1x256xf32> to vector<16x256xf32>
    %33 = arith.mulf %32, %28 : vector<16x256xf32>
    %34 = arith.select %31, %28, %33 : vector<16x256xi1>, vector<16x256xf32>
    %c0_25 = arith.constant 0 : index
    %c0_26 = arith.constant 0 : index
    %c0_27 = arith.constant 0 : index
    %35 = vector.load %arg8[%c0_25, %c0_26, %c0_27] : memref<1x16x256xf32, #tpu.memory_space<vmem>>, vector<1x16x256xf32>
    %36 = vector.shape_cast %35 : vector<1x16x256xf32> to vector<16x256xf32>
    %37 = vector.shape_cast %34 : vector<16x256xf32> to vector<1x16x256xf32>
    tpu.vector_store %arg8[%c0_25, %c0_26, %c0_27], %37 {strides = array<i32>} : memref<1x16x256xf32, #tpu.memory_space<vmem>>, vector<1x16x256xf32>,
    return
  }
  func.func @transform_0(%arg0: i32, %arg1: i32) -> (i32, i32, i32) {
    %c0_i32 = arith.constant 0 : i32
    %c0_i32_0 = arith.constant 0 : i32
    return %arg0, %arg1, %c0_i32 : i32, i32, i32
  }
  func.func @transform_1(%arg0: i32, %arg1: i32) -> (i32, i32, i32, i32) {
    %c16_i32 = arith.constant 16 : i32
    %0 = arith.muli %arg1, %c16_i32 : i32
    %c1_i32 = arith.constant 1 : i32
    %1 = arith.subi %0, %c1_i32 : i32
    %c0_i32 = arith.constant 0 : i32
    %2 = arith.maxsi %1, %c0_i32 : i32
    %c0_i32_0 = arith.constant 0 : i32
    %c0_i32_1 = arith.constant 0 : i32
    %c0_i32_2 = arith.constant 0 : i32
    return %arg0, %2, %c0_i32_0, %c0_i32_1 : i32, i32, i32, i32
  }
  func.func @transform_2(%arg0: i32, %arg1: i32) -> (i32, i32, i32, i32) {
    %c1_i32 = arith.constant 1 : i32
    %0 = arith.addi %arg1, %c1_i32 : i32
    %c16_i32 = arith.constant 16 : i32
    %1 = arith.muli %0, %c16_i32 : i32
    %c15_i32 = arith.constant 15 : i32
    %2 = arith.minsi %1, %c15_i32 : i32
    %c0_i32 = arith.constant 0 : i32
    %c0_i32_0 = arith.constant 0 : i32
    %c0_i32_1 = arith.constant 0 : i32
    return %arg0, %2, %c0_i32, %c0_i32_0 : i32, i32, i32, i32
  }
  func.func @transform_3(%arg0: i32, %arg1: i32) -> (i32, i32) {
    %c0_i32 = arith.constant 0 : i32
    %c0_i32_0 = arith.constant 0 : i32
    %c0_i32_1 = arith.constant 0 : i32
    return %c0_i32, %c0_i32_0 : i32, i32
  }
  func.func @transform_4(%arg0: i32, %arg1: i32) -> (i32, i32) {
    %c0_i32 = arith.constant 0 : i32
    %c0_i32_0 = arith.constant 0 : i32
    %c0_i32_1 = arith.constant 0 : i32
    return %c0_i32, %c0_i32_0 : i32, i32
  }
  func.func @transform_5(%arg0: i32, %arg1: i32) -> (i32, i32) {
    %c0_i32 = arith.constant 0 : i32
    %c0_i32_0 = arith.constant 0 : i32
    %c0_i32_1 = arith.constant 0 : i32
    return %c0_i32, %c0_i32_0 : i32, i32
  }
  func.func @transform_6(%arg0: i32, %arg1: i32) -> (i32, i32, i32) {
    %c0_i32 = arith.constant 0 : i32
    %c0_i32_0 = arith.constant 0 : i32
    return %arg0, %arg1, %c0_i32 : i32, i32, i32
  }
}

</mosaic_0001>

<bundles_post_ra>
// kernel: tpu_custom_call.1
= control target key start
LH: loop header
LB: loop body
LE: loop exit
PB: predicated region body
PF: predicated region fallthrough
CT: control target
= control target key end

     0   :  { %s1721_s0 = inlined_call_operand.hbm [shape: f32[2,16,64], index: 0, kind: input, shape index: {}]   ;;  %s1722_s1 = inlined_call_operand.hbm [shape: f32[2,16,1,64], index: 1, kind: input, shape index: {}]   ;;  %s1723_s2 = inlined_call_operand.hbm [shape: f32[2,16,1,64], index: 2, kind: input, shape index: {}]   ;;  %s1724_s3 = inlined_call_operand.hbm [shape: f32[192,256], index: 3, kind: input, shape index: {}]   ;;  %s1725_s4 = inlined_call_operand.vmem [shape: f32[1,256], index: 4, kind: input, shape index: {}]   ;;  %s1726_s5 = inlined_call_operand.vmem [shape: f32[1,256], index: 5, kind: input, shape index: {}]   ;;  %s1727_s6 = inlined_call_operand.hbm [shape: f32[2,16,256], index: 6, kind: output, shape index: {}]  }
   0x1   :  { %1745 = sst [smem:[#allocation22_spill]] %s1721_s0 }
   0x2   :  { %1746 = sst [smem:[#allocation23_spill]] %s1722_s1 }
   0x3   :  { %1747 = sst [smem:[#allocation24_spill]] %s1724_s3 }
   0x4   :  { %1748 = sst [smem:[#allocation25_spill]] %s1727_s6 }
   0x5   :  { %11 = vsyncpa [#allocation3], 0 }
   0x6   :  { %13 = vsyncpa [#allocation3 + $0x1], 0 }
   0x7   :  { %14 = vsyncpa [#allocation6], 0 }
   0x8   :  { %16 = vsyncpa [#allocation6 + $0x1], 0 }
   0x9   :  { %17 = vsyncpa [#allocation9], 0 }
   0xa   :  { %18 = vsyncpa [#allocation4], 0 }
   0xb   :  { %20 = vsyncpa [#allocation4 + $0x1], 0  ;;  %s1393_s21 = smov 0   ;;  %s1395_s22 = smov 0  }
   0xc   :  { %s1397_s23 = smov 0   ;;  %s1399_s24 = smov 0  }
   0xd   :  { %s1401_s25 = smov 0   ;;  %s1403_s26 = smov 0  }
   0xe LB: > { %1749 = sst [smem:[#allocation15_spill]] %s1324_s21  ;;  %s38_s27 = sadd.s32 1, %s1340_s25  ;;  %s1344_s26 = sphi %s1403_s26, %s26_s26   ;;  %s1340_s25 = sphi %s1401_s25, %s1784_s25   ;;  %s1336_s24 = sphi %s1399_s24, %s1783_s24   ;;  %s1332_s23 = sphi %s1397_s23, %s1782_s23   ;;  %s1328_s22 = sphi %s1395_s22, %s1786_s22   ;;  %s1324_s21 = sphi %s1393_s21, %s1785_s21  }
   0xf   : > { %1750 = sst [smem:[#allocation16_spill]] %s1332_s23  ;;  %s47_s28 = sadd.s32 1, %s1332_s23 }
  0x10   : > { %1751 = sst [smem:[#allocation17_spill]] %s1340_s25  ;;  %p40_p0 = scmp.ge.s32.totalorder %s38_s27, 2 }
  0x11   : > { %1752 = sst [smem:[#allocation18_spill]] %s1344_s26  ;;  %p1728_p1 = scmp.ne.s32.totalorder %s1332_s23, %s1328_s22 }
  0x12   : > { %p55_p2 = scmp.eq.s32.totalorder %s1344_s26, 0  ;;  %s1788_s27 = smov (%p40_p0, %s38_s27), 0 }
  0x13   : > { %1753 = sst [smem:[#allocation19_spill]] %s1788_s27  ;;  %p1077_p5 = scmp.lt.s32.totalorder %s1344_s26, 2 }
  0x14   : > { %p56_p4 = por %p55_p2, %p1728_p1  ;;  %s42_s29 = ssub.s32 %s1340_s25, %s1788_s27 }
  0x15   : > { %s1438_s30 = sand.u32 1, %s1332_s23   ;;  %p45_p6 = scmp.eq.s32.totalorder %s42_s29, 0 }
  0x16   : > { %s1441_s7 = sshll.u32 %s1340_s25, 8  ;;  %s1754_s0 = sld [smem:[#allocation22_spill]] }
  0x17   : > { %p1449_p7 = pnand %p1077_p5, %p56_p4  ;;  %s289_s13 = sand.u32 1, %s1344_s26  }
  0x18   : > { %s1454_s12 = scalar_select %p45_p6, %s1332_s23, %s47_s28  }
  0x19   : > { %s1755_s11 = scalar_select %p1449_p7, 1, 0 }
  0x1a   : > { %1756 = sst [smem:[#allocation20_spill]] %s1454_s12  ;;  %s1757_s1 = sld [smem:[#allocation23_spill]] }
  0x1b   : > { %s292_s17 = scalar_lea.vmem [#allocation5], %s1438_s30  ;;  %s1466_s19 = scalar_lea.sflag [#allocation6], %s289_s13 }
  0x1c   : > { %s1447_s10 = scalar_lea.hbm %s1754_s0, %s1441_s7  ;;  %s305_s18 = sshll.u32 %s292_s17, 4  ;;  %s1464_s18 = int_to_ptr.vmem [resolvable:$true] %s305_s18 }
  0x1d   : > { %p1472_p9 = pneg %p1449_p7 }
  0x1f   : > { %s1758_s28 = scalar_select %p1472_p9, 1, 0 }
  0x20   : > { %s1461_s16 = scalar_lea.hbm %s1757_s1, %s1441_s7  ;;  %s1141_s9 = scalar_lea.hbm %s1757_s1, 512 }
  0x21   : > { %s1136_s20 = scalar_lea.hbm %s1461_s16, 16  ;;  %p1142_p12 = scmp.lt.u32.totalorder %s1461_s16, %s1757_s1 }
  0x22   : > { %p1137_p8 = scmp.ne.s32.totalorder %s1461_s16, %s1136_s20  ;;  %p1143_p13 = scmp.lt.u32.totalorder %s1141_s9, %s1136_s20 }
  0x23   : > { %p1145_p2 = scmp.lt.u32.totalorder %s1136_s20, %s1461_s16 }
  0x24   : > { %p1139_p10 = pnand %p1472_p9, %p1137_p8  ;;  %p1144_p0 = por %p1143_p13, %p1142_p12 }
  0x26   : > { %p1140_p11 = pneg %p1139_p10  ;;  %p1146_p4 = por %p1145_p2, %p1144_p0 }
  0x28   : > { %p1147_p5 = pnand %p1146_p4, %p1140_p11 }
  0x2a   : > { %1150 = shalt.err (!%p1147_p5)
}
  0x2b   : > { %s1151_s13 = scalar_lea.vmem %s1464_s18, 16  ;;  %s1346_s17 = smov [#allocation5]  }
  0x2c   : > { %p1152_p6 = scmp.ne.s32.totalorder %s1464_s18, %s1151_s13  ;;  %s1156_s29 = sshll.u32 %s1346_s17, 4  ;;  %s1157_s29 = int_to_ptr.vmem [resolvable:$false] %s1156_s29 }
  0x2d   : > { %s1158_s8 = scalar_lea.vmem %s1157_s29, 32  ;;  %p1159_p3 = scmp.lt.s32.totalorder %s1464_s18, %s1157_s29 }
  0x2e   : > { %p1154_p8 = pnand %p1152_p6, %p1472_p9  ;;  %p1160_p1 = scmp.lt.s32.totalorder %s1158_s8, %s1151_s13 }
  0x30   : > { %p1155_p10 = pneg %p1154_p8  ;;  %p1161_p12 = por %p1160_p1, %p1159_p3 }
  0x32   : > { %p1162_p13 = pnand %p1161_p12, %p1155_p10 }
  0x34   : > { %1165 = shalt.err (!%p1162_p13)
}
  0x35   : > { %1068 = dma.hbm_to_vmem [thread:$0]  (!%p1449_p7), %s1461_s16, 16, %s1464_s18, %s1466_s19  }
  0x36   : > { %s1497_s20 = sadd.s32 4294967295, %s1344_s26   ;;  %s950_s9 = sadd.s32 4294967294, %s1344_s26  }
  0x37   : > { %p60_p1 = scmp.ne.s32.totalorder %s1328_s22, %s1324_s21  ;;  %p1735_p3 = scmp.eq.s32.totalorder %s1497_s20, 0 }
  0x38   : > { %p221_p11 = scmp.eq.s32.totalorder %s1497_s20, 1  ;;  %p227_p0 = scmp.eq.s32.totalorder %s950_s9, 1 }
  0x39   : > { %p951_p2 = scmp.ge.s32.totalorder %s1344_s26, 1  ;;  %p1507_p4 = por %p1735_p3, %p60_p1 }
  0x3a   : > { %p1760_p5 = scmp.ne.s32.totalorder %s1332_s23, %s1328_s22  ;;  %p1518_p8 = por %p227_p0, %p60_p1 }
  0x3b   : > { %s1759_s14 = scalar_select %p1507_p4, 1, 0 }
  0x3c   : > { %p1514_p6 = por %p221_p11, %p1760_p5  ;;  %p234_p10 = scmp.lt.s32.totalorder %s1344_s26, 3 }
  0x3d   : > { %s1762_s18 = scalar_select %p1518_p8, 1, 0 }
  0x3e   : > { %s1761_s16 = scalar_select %p1514_p6, 1, 0 }
  0x3f   : > { %1763 = sst [smem:[#allocation21_spill]] %s1762_s18  ;;  %p1523_p12 = pnand %p951_p2, %p234_p10 }
  0x40   : > { %s1347_s13 = smov [#allocation8]   ;;  %s954_s29 = sshll.u32 %s1438_s30, 4 }
  0x41   : > { %s1764_s15 = scalar_select %p1523_p12, 1, 0 }
  0x42   : > { %s246_s17 = sshll.u32 %s1347_s13, 4  ;;  %p1058_p13 = pneg %p1523_p12  ;;  %s1527_s17 = int_to_ptr.vmem [resolvable:$true] %s246_s17 }
  0x43   : > { %s270_s9 = scalar_lea.vmem [#allocation2], %s954_s29  ;;  %s1766_s3 = sld [smem:[#allocation24_spill]] }
  0x44   : > { %p1534_p11 = pnand %p1058_p13, %p1735_p3  ;;  %s279_s1 = sshll.u32 %s270_s9, 4  ;;  %s1538_s1 = int_to_ptr.vmem [resolvable:$true] %s279_s1 }
  0x46   : > { %p1168_p0 = pneg %p1534_p11 }
  0x49   : > { %s1166_s12 = scalar_lea.hbm %s1766_s3, 6144 }
  0x4a   : > { %p1167_p1 = scmp.ne.s32.totalorder %s1766_s3, %s1166_s12  ;;  %p1173_p10 = scmp.lt.u32.totalorder %s1166_s12, %s1766_s3 }
  0x4c   : > { %p1169_p2 = pnand %p1168_p0, %p1167_p1 }
  0x4e   : > { %p1170_p5 = pneg %p1169_p2 }
  0x50   : > { %p1175_p13 = pnand %p1173_p10, %p1170_p5 }
  0x52   : > { %1178 = shalt.err (!%p1175_p13)
}
  0x53   : > { %s1179_s29 = scalar_lea.vmem %s1527_s17, 6144  ;;  %p1187_p4 = scmp.lt.s32.totalorder %s1527_s17, %s1527_s17 }
  0x54   : > { %p1180_p3 = scmp.ne.s32.totalorder %s1527_s17, %s1179_s29  ;;  %p1188_p12 = scmp.lt.s32.totalorder %s1179_s29, %s1179_s29 }
  0x56   : > { %p1182_p8 = pnand %p1180_p3, %p1168_p0  ;;  %p1189_p7 = por %p1188_p12, %p1187_p4 }
  0x58   : > { %p1183_p6 = pneg %p1182_p8 }
  0x5a   : > { %p1190_p9 = pnand %p1189_p7, %p1183_p6 }
  0x5c   : > { %1193 = shalt.err (!%p1190_p9)
}
  0x5d   : > { %s1348_s23 = smov 256   ;;  %s1349_s25 = smov 16  }
  0x5e   : > { %1061 = dma.hbm_to_vmem [thread:$0]  (!%p1534_p11), %s1766_s3, 6144, %s1527_s17, [#allocation9], %s1348_s23, %s1348_s23, %s1349_s25  }
  0x5f   : > { %s267_s12 = scalar_lea.sflag [#allocation3], %s1438_s30  ;;  %s1194_s18 = scalar_lea.hbm %s1447_s10, 256 }
  0x60   : > { %p1195_p3 = scmp.ne.s32.totalorder %s1447_s10, %s1194_s18  ;;  %p1767_p7 = scmp.ne.s32.totalorder %s1758_s28, 0 }
  0x61   : > { %s1199_s29 = scalar_lea.hbm %s1754_s0, 512  ;;  %p1200_p6 = scmp.lt.u32.totalorder %s1447_s10, %s1754_s0 }
  0x62   : > { %p1197_p9 = pnand %p1195_p3, %p1767_p7  ;;  %p1201_p8 = scmp.lt.u32.totalorder %s1199_s29, %s1194_s18 }
  0x63   : > { %p1203_p1 = scmp.lt.u32.totalorder %s1194_s18, %s1447_s10 }
  0x64   : > { %p1198_p4 = pneg %p1197_p9  ;;  %p1202_p12 = por %p1201_p8, %p1200_p6 }
  0x66   : > { %p1204_p0 = por %p1203_p1, %p1202_p12 }
  0x68   : > { %p1205_p2 = pnand %p1204_p0, %p1198_p4 }
  0x6a   : > { %1208 = shalt.err (!%p1205_p2)
}
  0x6b   : > { %s1209_s17 = scalar_lea.vmem %s1538_s1, 256  ;;  %s1350_s8 = smov [#allocation2]  }
  0x6c   : > { %p1210_p11 = scmp.ne.s32.totalorder %s1538_s1, %s1209_s17  ;;  %s1214_s23 = sshll.u32 %s1350_s8, 4  ;;  %s1215_s23 = int_to_ptr.vmem [resolvable:$false] %s1214_s23 }
  0x6d   : > { %s1216_s6 = scalar_lea.vmem %s1215_s23, 512  ;;  %p1217_p13 = scmp.lt.s32.totalorder %s1538_s1, %s1215_s23 }
  0x6e   : > { %p1212_p5 = pnand %p1210_p11, %p1767_p7  ;;  %p1218_p3 = scmp.lt.s32.totalorder %s1216_s6, %s1209_s17 }
  0x70   : > { %p1213_p10 = pneg %p1212_p5  ;;  %p1219_p9 = por %p1218_p3, %p1217_p13 }
  0x72   : > { %p1220_p6 = pnand %p1219_p9, %p1213_p10 }
  0x74   : > { %1223 = shalt.err (!%p1220_p6)
}
  0x75   : > { %s1351_s21 = smov 128   ;;  %s1352_s25 = smov 8  }
  0x76   : > { %p1768_p4 = scmp.ne.s32.totalorder %s1755_s11, 0  ;;  %s979_s26 = sadd.s32 240, %s1441_s7 }
  0x77   : > { %s315_s27 = scalar_lea.vmem [#allocation7], %s1438_s30  ;;  %s326_s29 = scalar_lea.hbm %s1723_s2, %s979_s26 }
  0x78   : > { %1065 = dma.hbm_to_vmem [thread:$0]  (!%p1768_p4), %s1447_s10, 256, %s1538_s1, %s267_s12, %s1351_s21, %s1351_s21, %s1352_s25  }
  0x79   : > { %s328_s18 = sshll.u32 %s315_s27, 4  ;;  %s1224_s17 = scalar_lea.hbm %s326_s29, 16  ;;  %s329_s18 = int_to_ptr.vmem [resolvable:$true] %s328_s18 }
  0x7a   : > { %p1225_p8 = scmp.ne.s32.totalorder %s326_s29, %s1224_s17  ;;  %s1229_s6 = scalar_lea.hbm %s1723_s2, 512 }
  0x7b   : > { %p1230_p0 = scmp.lt.u32.totalorder %s326_s29, %s1723_s2  ;;  %p1231_p2 = scmp.lt.u32.totalorder %s1229_s6, %s1224_s17 }
  0x7c   : > { %p1227_p12 = pnand %p1225_p8, %p1767_p7  ;;  %p1233_p5 = scmp.lt.u32.totalorder %s1224_s17, %s326_s29 }
  0x7d   : > { %p1232_p11 = por %p1231_p2, %p1230_p0 }
  0x7e   : > { %p1228_p1 = pneg %p1227_p12 }
  0x7f   : > { %p1234_p10 = por %p1233_p5, %p1232_p11 }
  0x81   : > { %p1235_p13 = pnand %p1234_p10, %p1228_p1 }
  0x83   : > { %1238 = shalt.err (!%p1235_p13)
}
  0x84   : > { %s1239_s1 = scalar_lea.vmem %s329_s18, 16  ;;  %s1353_s30 = smov [#allocation7]  }
  0x85   : > { %p1240_p3 = scmp.ne.s32.totalorder %s329_s18, %s1239_s1  ;;  %s1244_s7 = sshll.u32 %s1353_s30, 4  ;;  %s1245_s7 = int_to_ptr.vmem [resolvable:$false] %s1244_s7 }
  0x86   : > { %s1246_s10 = scalar_lea.vmem %s1245_s7, 32  ;;  %p1247_p8 = scmp.lt.s32.totalorder %s329_s18, %s1245_s7 }
  0x87   : > { %p1242_p9 = pnand %p1240_p3, %p1767_p7  ;;  %p1248_p12 = scmp.lt.s32.totalorder %s1246_s10, %s1239_s1 }
  0x89   : > { %p1243_p6 = pneg %p1242_p9  ;;  %p1249_p4 = por %p1248_p12, %p1247_p8 }
  0x8b   : > { %p1250_p0 = pnand %p1249_p4, %p1243_p6 }
  0x8d   : > { %1253 = shalt.err (!%p1250_p0)
}
  0x8e   : > { %p1769_p2 = scmp.ne.s32.totalorder %s1755_s11, 0  ;;  %p1770_p1 = scmp.ne.s32.totalorder %s1764_s15, 0 }
  0x8f   : > { %s1606_s0 = sand.u32 (!%p1770_p1), 1, %s1328_s22   ;;  %p1771_p7 = scmp.ne.s32.totalorder (!%p1770_p1), %s1759_s14, 0 }
  0x90   : > { %1071 = dma.hbm_to_vmem [thread:$0]  (!%p1769_p2), %s326_s29, 16, %s329_s18, %s1466_s19  }
  0x91   : > { %337 = sbr.rel (%p1770_p1) target bundleno = 431 (0x1af), region = 44  ;;  %s962_s3 = sshll.u32 (!%p1770_p1), %s1606_s0, 4 }
  0x92   : > { %s340_s28 = scalar_lea.sflag (!%p1770_p1), [#allocation3], %s1606_s0  ;;  %s1610_s12 = scalar_lea.vmem (!%p1770_p1), [#allocation2], %s962_s3 }
  0x98   : > { %1307 = dma.done.wait (%p1771_p7), %s340_s28, 256  }
  0x99   : > { %1309 = vsyncadd (%p1771_p7), %s340_s28, 4294967040  ;;  %s348_s11 = sand.u32 1, %s1497_s20  }
  0x9a   : > { %s349_s19 = scalar_lea.sflag [#allocation6], %s348_s11 }
  0x9b   : > { %1311 = dma.done.wait (%p1771_p7), %s349_s19, 32  }
  0x9c   : > { %1313 = vsyncadd (%p1771_p7), %s349_s19, 4294967264  ;;  %p1772_p4 = scmp.eq.s32.totalorder %s1497_s20, 0 }
  0x9e   : > { %1315 = dma.done.wait (%p1772_p4), [#allocation9], 6144   ;;  %p1773_p11 = pmov %p1772_p4 }
  0x9f   : > { %v1354_v0 = vmov 0.0   ;;  %v457_v1 = vld [vmem:[#allocation8 + $0x88] sm:$0xff]  ;;  %v459_v2 = vld [vmem:[#allocation8 + $0x98] sm:$0xff]  ;;  %v433_v4 = vlaneseq  ;;  %v456_v7 = vld [vmem:[#allocation8 + $0x80] sm:$0xff]  ;;  %vm426_vm0 = vcmask 1040384   ;;  %vm474_vm1 = vcmask 1046528  }
  0xa0   : > { %1317 = vsyncadd (%p1773_p11), [#allocation9], 4294961152  ;;  %549 = vmatprep.mubr.f32.mxu1 %v1354_v0  ;;  %630 = vmatprep.mubr.f32.mxu0 %v1354_v0  ;;  %v441_v3 = vld [vmem:[#allocation8 + $0x8] sm:$0xff]  ;;  %v982_v5 = vpack.c.bf16 %v459_v2, %v457_v1  ;;  %v443_v6 = vld [vmem:[#allocation8 + $0x18] sm:$0xff]  ;;  %vm480_vm2 = vcmask 523264   ;;  %vm659_vm3 = vcmask 1045504  }
  0xa1   : > { %v458_v8 = vld [vmem:[#allocation8 + $0x90] sm:$0xff]  ;;  %v998_v9 = vpack.c.bf16 %v443_v6, %v441_v3  ;;  %v440_v11 = vld [vmem:[#allocation8] sm:$0xff]  ;;  %v461_v13 = vld [vmem:[#allocation8 + $0xa8] sm:$0xff]  ;;  %v1627_v23 = vshrl.u32 %v433_v4, 7  ;;  %s964_s15 = sshll.u32 %s1606_s0, 5  ;;  %s980_s18 = sshll.u32 %s1336_s24, 9 }
  0xa2   : > { %v984_v10 = vpack.c.bf16 %v458_v8, %v456_v7  ;;  %v442_v12 = vld [vmem:[#allocation8 + $0x10] sm:$0xff]  ;;  %983 = vmatprep.subr.bf16.mxu1 %v982_v5  ;;  %v463_v15 = vld [vmem:[#allocation8 + $0xb8] sm:$0xff]  ;;  %v445_v16 = vld [vmem:[#allocation8 + $0x28] sm:$0xff]  ;;  %s399_s26 = scalar_lea.vmem [#allocation10], %s964_s15  ;;  %s1774_s29 = sld [smem:[#allocation25_spill]] }
  0xa3   : > { %v1000_v14 = vpack.c.bf16 %v442_v12, %v440_v11  ;;  %v447_v17 = vld [vmem:[#allocation8 + $0x38] sm:$0xff]  ;;  %999 = vmatprep.subr.bf16.mxu0 %v998_v9  ;;  %v986_v18 = vpack.c.bf16 %v463_v15, %v461_v13  ;;  %v460_v20 = vld [vmem:[#allocation8 + $0xa0] sm:$0xff]  ;;  %v462_v21 = vld [vmem:[#allocation8 + $0xb0] sm:$0xff]  ;;  %v1630_v41 = vsub.s32 0, %v1627_v23  ;;  %s811_s27 = sshll.u32 %s399_s26, 4  ;;  %s795_s17 = scalar_lea.sflag [#allocation4], %s1606_s0  ;;  %s1667_s27 = int_to_ptr.vmem [resolvable:$true] %s811_s27 }
  0xa4   : > { %985 = vmatpush1.bf16.msra.mxu1 %v984_v10  ;;  %v1002_v19 = vpack.c.bf16 %v447_v17, %v445_v16  ;;  %v444_v22 = vld [vmem:[#allocation8 + $0x20] sm:$0xff]  ;;  %v988_v24 = vpack.c.bf16 %v462_v21, %v460_v20  ;;  %v446_v25 = vld [vmem:[#allocation8 + $0x30] sm:$0xff]  ;;  %v465_v26 = vld [vmem:[#allocation8 + $0xc8] sm:$0xff]  ;;  %s1254_s8 = scalar_lea.vmem %s1667_s27, 512  ;;  %p1775_p10 = scmp.ne.s32.totalorder %s1761_s16, 0 }
  0xa5   : > { %1001 = vmatpush1.bf16.msra.mxu0 %v1000_v14  ;;  %v467_v27 = vld [vmem:[#allocation8 + $0xd8] sm:$0xff]  ;;  %987 = vmatprep.subr.bf16.mxu1 %v986_v18  ;;  %v1004_v28 = vpack.c.bf16 %v446_v25, %v444_v22  ;;  %v449_v30 = vld [vmem:[#allocation8 + $0x48] sm:$0xff]  ;;  %v464_v32 = vld [vmem:[#allocation8 + $0xc0] sm:$0xff]  ;;  %v436_v57 = vrot.slane %v1354_v0, %v1630_v41  ;;  %p1255_p5 = scmp.ne.s32.totalorder %s1667_s27, %s1254_s8  ;;  %s1355_s23 = smov [#allocation10]  }
  0xa6   : > { %1003 = vmatprep.subr.bf16.mxu0 %v1002_v19  ;;  %v990_v29 = vpack.c.bf16 %v467_v27, %v465_v26  ;;  %v451_v31 = vld [vmem:[#allocation8 + $0x58] sm:$0xff]  ;;  %v466_v34 = vld [vmem:[#allocation8 + $0xd0] sm:$0xff]  ;;  %v448_v35 = vld [vmem:[#allocation8 + $0x40] sm:$0xff]  ;;  %s1258_s6 = sshll.u32 %s1355_s23, 4  ;;  %s1259_s6 = int_to_ptr.vmem [resolvable:$false] %s1258_s6 }
  0xa7   : > { %v1006_v33 = vpack.c.bf16 %v451_v31, %v449_v30  ;;  %v450_v36 = vld [vmem:[#allocation8 + $0x50] sm:$0xff]  ;;  %v992_v37 = vpack.c.bf16 %v466_v34, %v464_v32  ;;  %v469_v38 = vld [vmem:[#allocation8 + $0xe8] sm:$0xff]  ;;  %v471_v39 = vld [vmem:[#allocation8 + $0xf8] sm:$0xff]  ;;  %p1256_p13 = pnand %p1255_p5, %p1775_p10  ;;  %s1260_s1 = scalar_lea.vmem %s1259_s6, 1024 }
  0xa8   : > { %989 = vmatpush1.bf16.msra.mxu1 %v988_v24  ;;  %v453_v40 = vld [vmem:[#allocation8 + $0x68] sm:$0xff]  ;;  %v1008_v42 = vpack.c.bf16 %v450_v36, %v448_v35  ;;  %v994_v43 = vpack.c.bf16 %v471_v39, %v469_v38  ;;  %v455_v44 = vld [vmem:[#allocation8 + $0x78] sm:$0xff]  ;;  %v468_v45 = vld [vmem:[#allocation8 + $0xe0] sm:$0xff]  ;;  %s1672_s24 = scalar_lea.hbm %s1774_s29, %s980_s18  ;;  %p1261_p9 = scmp.lt.s32.totalorder %s1667_s27, %s1259_s6 }
  0xa9   : > { %1005 = vmatpush1.bf16.msra.mxu0 %v1004_v28  ;;  %991 = vmatprep.subr.bf16.mxu1 %v990_v29  ;;  %v470_v46 = vld [vmem:[#allocation8 + $0xf0] sm:$0xff]  ;;  %v1010_v47 = vpack.c.bf16 %v455_v44, %v453_v40  ;;  %v452_v48 = vld [vmem:[#allocation8 + $0x60] sm:$0xff]  ;;  %v644_v53 = vld [vmem:[#allocation8 + $0x108] sm:$0xff]  ;;  %v758_v40 = vsub.s32 1, %v1627_v23  ;;  %p1257_p3 = pneg %p1256_p13  ;;  %p1262_p6 = scmp.lt.s32.totalorder %s1260_s1, %s1254_s8 }
  0xaa   : > { %1007 = vmatprep.subr.bf16.mxu0 %v1006_v33  ;;  %v454_v49 = vld [vmem:[#allocation8 + $0x70] sm:$0xff]  ;;  %v646_v54 = vld [vmem:[#allocation8 + $0x118] sm:$0xff]  ;;  %v996_v55 = vpack.c.bf16 %v470_v46, %v468_v45  ;;  %v643_v61 = vld [vmem:[#allocation8 + $0x100] sm:$0xff] }
  0xab   : > { %v410_v50 = vld [vmem:[%s1610_s12] sm:$0xff]  ;;  %v411_v51 = vld [vmem:[%s1610_s12 + $0x8] sm:$0xff]  ;;  %v1012_v58 = vpack.c.bf16 %v454_v49, %v452_v48  ;;  %v1014_v60 = vpack.c.bf16 %v646_v54, %v644_v53  ;;  %p1263_p8 = por %p1262_p6, %p1261_p9 }
  0xac   : > { %v427_v52 = vrot.slane %v410_v50, 7  ;;  %993 = vmatpush1.bf16.msra.mxu1 %v992_v37  ;;  %v428_v56 = vrot.slane %v411_v51, 7  ;;  %v645_v62 = vld [vmem:[#allocation8 + $0x110] sm:$0xff]  ;;  %v648_v2 = vld [vmem:[#allocation8 + $0x128] sm:$0xff]  ;;  %v650_v3 = vld [vmem:[#allocation8 + $0x138] sm:$0xff] }
  0xad   : > { %1009 = vmatpush1.bf16.msra.mxu0 %v1008_v42  ;;  %995 = vmatprep.subr.bf16.mxu1 %v994_v43  ;;  %v1016_v5 = vpack.c.bf16 %v645_v62, %v643_v61  ;;  %v1018_v8 = vpack.c.bf16 %v650_v3, %v648_v2  ;;  %v647_v9 = vld [vmem:[#allocation8 + $0x120] sm:$0xff]  ;;  %v649_v10 = vld [vmem:[#allocation8 + $0x130] sm:$0xff]  ;;  %v652_v12 = vld [vmem:[#allocation8 + $0x148] sm:$0xff]  ;;  %p1264_p12 = pnand %p1263_p8, %p1257_p3 }
  0xae   : > { %v1637_v59 = vsel %vm426_vm0, 0.0, %v427_v52  ;;  %1011 = vmatprep.subr.bf16.mxu0 %v1010_v47  ;;  %v429_v63 = vsel %vm426_vm0, %v427_v52, %v428_v56  ;;  %v439_v6 = vsel %vm426_vm0, %v428_v56, %v436_v57  ;;  %v654_v13 = vld [vmem:[#allocation8 + $0x158] sm:$0xff]  ;;  %v1020_v14 = vpack.c.bf16 %v649_v10, %v647_v9  ;;  %v651_v17 = vld [vmem:[#allocation8 + $0x140] sm:$0xff]  ;;  %v653_v18 = vld [vmem:[#allocation8 + $0x150] sm:$0xff] }
  0xaf   : > { %v475_v1 = vrot.slane %v1637_v59, 1  ;;  %v476_v4 = vrot.slane %v429_v63, 1  ;;  %v478_v11 = vrot.slane %v439_v6, 1  ;;  %v1022_v16 = vpack.c.bf16 %v654_v13, %v652_v12  ;;  %v656_v19 = vld [vmem:[#allocation8 + $0x168] sm:$0xff]  ;;  %v658_v20 = vld [vmem:[#allocation8 + $0x178] sm:$0xff]  ;;  %v655_v24 = vld [vmem:[#allocation8 + $0x160] sm:$0xff] }
  0xb0   : > { %997 = vmatpush1.bf16.msra.mxu1 %v996_v55  ;;  %v1024_v21 = vpack.c.bf16 %v653_v18, %v651_v17  ;;  %v1026_v22 = vpack.c.bf16 %v658_v20, %v656_v19  ;;  %v657_v25 = vld [vmem:[#allocation8 + $0x170] sm:$0xff]  ;;  %v661_v26 = vrot.slane %v429_v63, 2  ;;  %v663_v27 = vrot.slane %v439_v6, 2  ;;  %v750_v39 = vld [vmem:[%s1725_s4] sm:$0x3] }
  0xb1   : > { %1013 = vmatpush1.bf16.msra.mxu0 %v1012_v58  ;;  %v477_v7 = vsel %vm474_vm1, %v475_v1, %v476_v4  ;;  %1030 = vmatprep.subr.bf16.mxu1 %v1014_v60  ;;  %v479_v15 = vsel %vm474_vm1, %v476_v4, %v478_v11  ;;  %v1028_v28 = vpack.c.bf16 %v657_v25, %v655_v24  ;;  %v660_v29 = vrot.slane %v1637_v59, 2  ;;  %v766_v42 = vld [vmem:[%s1726_s5] sm:$0x3] }
  0xb2   : > { %1015 = vmatprep.subr.bf16.mxu0 %v1014_v60  ;;  %v664_v30 = vsel %vm659_vm3, %v661_v26, %v663_v27  ;;  %v755_v43 = vrot.slane %v750_v39, %v1630_v41  ;;  %v759_v45 = vrot.slane %v750_v39, %v758_v40  ;;  %v775_v47 = vrot.slane %v766_v42, %v1630_v41 }
  0xb3   : > { %965 = vmatmul.mubr.msk.f32.vlgmr.msra.gmra.mrb[0].mxu1 %vm480_vm2, %v477_v7  ;;  %v662_v31 = vsel %vm659_vm3, %v660_v29, %v661_v26  ;;  %v779_v52 = vrot.slane %v766_v42, %v758_v40 }
  0xb4   : > { %967 = vmatmul.mubr.msk.f32.vlgmr.msra.gmra.mrb[0].mxu0 %vm480_vm2, %v1637_v59  ;;  %1034 = vmatpush1.bf16.msra.mxu1 %v1016_v5 }
  0xb5   : > { %1017 = vmatpush1.bf16.msra.mxu0 %v1016_v5  ;;  %1031 = vmatprep.subr.bf16.mxu1 %v1018_v8 }
  0xb6   : > { %1019 = vmatprep.subr.bf16.mxu0 %v1018_v8  ;;  %555 = vmatprep.mubr.f32.mxu1 %v1354_v0 }
  0xb7   : > { %636 = vmatprep.mubr.f32.mxu0 %v1354_v0  ;;  %966 = vmatmul.mubr.msk.f32.gmra.mrb[2].mxu1 %vm480_vm2, %v479_v15 }
  0xb8   : > { %1035 = vmatpush1.bf16.msra.mxu1 %v1020_v14  ;;  %968 = vmatmul.mubr.msk.f32.gmra.mrb[2].mxu0 %vm480_vm2, %v429_v63 }
  0xb9   : > { %1021 = vmatpush1.bf16.msra.mxu0 %v1020_v14  ;;  %1032 = vmatprep.subr.bf16.mxu1 %v1022_v16 }
  0xba   : > { %1023 = vmatprep.subr.bf16.mxu0 %v1022_v16  ;;  %733 = vmatprep.mubr.f32.mxu0 %v1354_v0 }
  0xbb   : > { %739 = vmatprep.mubr.f32.mxu1 %v1354_v0 }
  0xbc   : > { %1036 = vmatpush1.bf16.msra.mxu1 %v1024_v21 }
  0xbd   : > { %1025 = vmatpush1.bf16.msra.mxu0 %v1024_v21  ;;  %1033 = vmatprep.subr.bf16.mxu1 %v1026_v22 }
  0xbe   : > { %1027 = vmatprep.subr.bf16.mxu0 %v1026_v22 }
  0xc0   : > { %1037 = vmatpush1.bf16.msra.mxu1 %v1028_v28 }
  0xc1   : > { %1029 = vmatpush1.bf16.msra.mxu0 %v1028_v28 }
  0xc3   : > { %970 = vmatmul.mubr.msk.f32.vlgmr.msra.gmra.mrb[4].mxu1 %vm480_vm2, %v664_v30 }
  0xc4   : > { %969 = vmatmul.mubr.msk.f32.vlgmr.msra.gmra.mrb[0].mxu0 %vm480_vm2, %v662_v31 }
 0x186   : > { %v551_v0 = vpop.f32.mrb[0].mxu1 }
 0x187   : > { %v553_v32 = vpop.f32.mrb[1].mxu1 }
 0x18a   : > { %v557_v33 = vpop.f32.mrb[2].mxu1 }
 0x18b   : > { %v638_v34 = vpop.f32.mrb[2].mxu0  ;;  %v559_v35 = vpop.f32.mrb[3].mxu1 }
 0x18c   : > { %v639_v36 = vadd.f32 %v638_v34, %v557_v33  ;;  %v640_v37 = vpop.f32.mrb[3].mxu0 }
 0x18d   : > { %v641_v38 = vadd.f32 %v640_v37, %v559_v35 }
 0x196   : > { %v741_v44 = vpop.f32.mrb[4].mxu1 }
 0x197   : > { %v735_v46 = vpop.f32.mrb[0].mxu0  ;;  %v748_v48 = vadd.f32 %v741_v44, %v639_v36  ;;  %v743_v49 = vpop.f32.mrb[5].mxu1 }
 0x198   : > { %v1038_v50 = vadd.f32 %v735_v46, %v551_v0  ;;  %v737_v51 = vpop.f32.mrb[1].mxu0  ;;  %v749_v53 = vadd.f32 %v743_v49, %v641_v38 }
 0x199   : > { %v764_v23 = vadd.f32 %v755_v43, %v748_v48  ;;  %v1039_v54 = vadd.f32 %v737_v51, %v553_v32 }
 0x19a   : > { %v762_v55 = vadd.f32 %v1038_v50, %v755_v43  ;;  %v765_v56 = vadd.f32 %v759_v45, %v749_v53 }
 0x19b   : > { %vm769_vm4 = vcmp.ge.f32.partialorder %v764_v23, 0.0  ;;  %v784_v57 = vmul.f32 %v775_v47, %v764_v23  ;;  %v763_v58 = vadd.f32 %v1039_v54, %v759_v45 }
 0x19c   : > { %vm767_vm5 = vcmp.ge.f32.partialorder %v762_v55, 0.0  ;;  %v782_v59 = vmul.f32 %v775_v47, %v762_v55  ;;  %vm770_vm6 = vcmp.ge.f32.partialorder %v765_v56, 0.0  ;;  %v785_v41 = vmul.f32 %v779_v52, %v765_v56 }
 0x19d   : > { %v788_v60 = vsel %vm769_vm4, %v764_v23, %v784_v57  ;;  %vm768_vm7 = vcmp.ge.f32.partialorder %v763_v58, 0.0  ;;  %v783_v61 = vmul.f32 %v779_v52, %v763_v58 }
 0x19e   : > { %v786_v62 = vsel %vm767_vm5, %v762_v55, %v782_v59  ;;  %792 = vst [vmem:[%s399_s26 + $0x10] sm:$0xff] %v788_v60  ;;  %v789_v63 = vsel %vm770_vm6, %v765_v56, %v785_v41 }
 0x19f   : > { %790 = vst [vmem:[%s399_s26] sm:$0xff] %v786_v62  ;;  %v787_v1 = vsel %vm768_vm7, %v763_v58, %v783_v61  ;;  %793 = vst [vmem:[%s399_s26 + $0x18] sm:$0xff] %v789_v63 }
 0x1a0   : > { %791 = vst [vmem:[%s399_s26 + $0x8] sm:$0xff] %v787_v1 }
 0x1a1   : > { %1267 = shalt.err (!%p1264_p12)
}
 0x1a2   : > { %s1268_s30 = scalar_lea.hbm %s1672_s24, 512  ;;  %s1272_s3 = scalar_lea.hbm %s1774_s29, 1024 }
 0x1a3   : > { %p1269_p0 = scmp.ne.s32.totalorder %s1672_s24, %s1268_s30  ;;  %p1273_p7 = scmp.lt.u32.totalorder %s1672_s24, %s1774_s29 }
 0x1a4   : > { %p1274_p4 = scmp.lt.u32.totalorder %s1272_s3, %s1268_s30  ;;  %p1276_p5 = scmp.lt.u32.totalorder %s1268_s30, %s1672_s24 }
 0x1a5   : > { %p1270_p2 = pnand %p1269_p0, %p1775_p10 }
 0x1a6   : > { %p1275_p11 = por %p1274_p4, %p1273_p7 }
 0x1a7   : > { %p1271_p1 = pneg %p1270_p2 }
 0x1a8   : > { %p1277_p13 = por %p1276_p5, %p1275_p11 }
 0x1aa   : > { %p1278_p3 = pnand %p1277_p13, %p1271_p1 }
 0x1ac   : > { %1281 = shalt.err (!%p1278_p3)
}
 0x1ad   : > { %s1356_s11 = smov 256   ;;  %s1357_s19 = smov 16  }
 0x1ae   : > { %1056 = dma.vmem_to_hbm [thread:$0]  (%p1775_p10), %s1667_s27, 512, %s1672_s24, %s795_s17, %s1356_s11, %s1356_s11, %s1357_s19  }
 0x1af PF: > { %s1776_s20 = sld [smem:[#allocation15_spill]]  ;;  %s1777_s14 = sld [smem:[#allocation21_spill]] }
 0x1b0   : > { %s1778_s15 = sld [smem:[#allocation18_spill]] }
 0x1b5   : > { %s826_s21 = sand.u32 1, %s1776_s20   ;;  %p1779_p9 = scmp.ne.s32.totalorder %s1777_s14, 0 }
 0x1b6   : > { %p1780_p6 = scmp.ge.s32.totalorder %s1778_s15, 2  ;;  %s827_s25 = scalar_lea.sflag [#allocation4], %s826_s21 }
 0x1b8   : > { %p1073_p8 = pnand %p1780_p6, %p1779_p9 }
 0x1ba   : > { %1319 = dma.done.wait (!%p1073_p8), %s827_s25, 512  }
 0x1bb   : > { %1321 = vsyncadd (!%p1073_p8), %s827_s25, 4294966784  ;;  %s26_s26 = sadd.s32 1, %s1778_s15   ;;  %s1781_s18 = sld [smem:[#allocation16_spill]] }
 0x1bc   : > { %p23_p12 = scmp.ge.s32.totalorder %s26_s26, 4   ;;  %s1782_s23 = sld [smem:[#allocation20_spill]] }
 0x1bd   : > { %s1783_s24 = sld [smem:[#allocation17_spill]]  ;;  %s1784_s25 = sld [smem:[#allocation19_spill]] }
 0x1be   : > { %s1785_s21 = smov %s1328_s22  ;;  %25 = sbr.rel (!%p23_p12) target bundleno = 14 (0xe), region = 117 }
 0x1c1   : > { %s1786_s22 = smov %s1781_s18 }
 0x1c5   :  { %832 = vsyncpa [#allocation3], 1 }
 0x1c6   :  { %834 = vsyncpa [#allocation3 + $0x1], 1 }
 0x1c7   :  { %835 = vsyncpa [#allocation6], 1 }
 0x1c8   :  { %837 = vsyncpa [#allocation6 + $0x1], 1 }
 0x1c9   :  { %838 = vsyncpa [#allocation9], 1 }
 0x1ca   :  { %839 = vsyncpa [#allocation4], 1 }
 0x1cb   :  { %841 = vsyncpa [#allocation4 + $0x1], 1 }

</bundles_post_ra>
